<compile_context>
chip_gen: v7x
topology: tpu7x:2x2x1
jax: 0.10.0
libtpu: 0.0.40
codegen_flags: <defaults>
</compile_context>

<pallas_src>
import numpy as np
import jax
import jax.numpy as jnp
from jax import lax
from jax.experimental import pallas as pl
from jax.experimental.pallas import tpu as pltpu

CZ = 32   # controller feature size
M = 20    # memory word width
N = 128   # number of memory slots
H = M + 1 + 1 + 3 + 1   # fused controller output width (k|b|g|s|y) = 26


def _softplus(x):
    return jnp.logaddexp(x, 0.0)


# --------------------------------------------------------------------------
# Kernel: one grid step == one HEAD forward; w carried across steps in VMEM.
# --------------------------------------------------------------------------
def head_seq_kernel(cin_ref, memT_ref, wcatb_ref, winit_ref,   # inputs
                    read_ref, wt_ref,                          # outputs
                    w_scr, memsq_scr):                         # VMEM scratch
    t = pl.program_id(0)

    memT = memT_ref[...]                       # (M, N): words on sublanes, slots on lanes

    @pl.when(t == 0)
    def _():
        # init the carried weighting and hoist the per-slot squared norms
        # (memory is read-only for this head -> compute once, keep resident).
        w_scr[...] = winit_ref[...]
        memsq_scr[...] = jnp.sum(memT * memT, axis=0, keepdims=True)

    cin = cin_ref[0]                           # (1, CZ)
    wcatb = wcatb_ref[...]                     # (H, CZ+1)  packed [Wcat | bcat]

    # --- fused controller heads: one VPU GEMV (exact f32, no MXU) ---
    h = (jnp.sum(wcatb[:, 0:CZ] * cin, axis=-1, keepdims=True)
         + wcatb[:, CZ:CZ + 1])                # (H, 1)

    k = h[0:M, :]                              # (M, 1)
    b = _softplus(h[M:M + 1, :])               # (1, 1)
    g = jax.nn.sigmoid(h[M + 1:M + 2, :])      # (1, 1)
    s_logits = h[M + 2:M + 5, :]               # (3, 1)
    y = _softplus(h[M + 5:M + 6, :]) + 1.0     # (1, 1)

    sz = s_logits - jnp.max(s_logits, axis=0, keepdims=True)
    es = jnp.exp(sz)
    s = es / jnp.sum(es, axis=0, keepdims=True)              # (3, 1)

    # --- content addressing: cosine similarity along the word dim (sublanes) ---
    eps = jnp.float32(1e-8)
    num = jnp.sum(memT * k, axis=0, keepdims=True)            # (1, N)
    k_sq = jnp.sum(k * k, axis=0, keepdims=True)              # (1, 1)
    wc = num * lax.rsqrt(jnp.maximum(memsq_scr[...] * k_sq, eps * eps))

    # --- focus by key strength: softmax over the N slots (exact division) ---
    z = wc * b
    z = z - jnp.max(z, axis=-1, keepdims=True)
    ez = jnp.exp(z)
    wc = ez / jnp.sum(ez, axis=-1, keepdims=True)

    # --- interpolation gate with the carried previous weighting ---
    wprev = w_scr[...]
    wgt = wc * g + (1.0 - g) * wprev                          # (1, N)

    # --- circular shift: XLU lane rotate ---
    wm = pltpu.roll(wgt, N - 1, 1)     # == jnp.roll(wgt, -1, axis=1)
    wp = pltpu.roll(wgt, 1, 1)         # == jnp.roll(wgt, +1, axis=1)
    wt = s[0:1, :] * wm + s[1:2, :] * wgt + s[2:3, :] * wp    # (1, N)

    # --- sharpening wt ** y then EXACT L1 normalize (wt > 0 by construction;
    #     tiny clamp only guards log(0)) ---
    wt = jnp.exp(y * jnp.log(jnp.maximum(wt, jnp.float32(1e-30))))
    l1 = jnp.sum(jnp.abs(wt), axis=-1, keepdims=True)
    wt = wt / jnp.maximum(l1, jnp.float32(1e-12))

    w_scr[...] = wt                    # carry to next timestep
    wt_ref[0] = wt                     # lane-dense (1, N) store

    # --- lane-dense read: (1,N) . (M,N)^T contraction on the (idle) MXU ---
    read_ref[0] = lax.dot_general(
        wt, memT,
        dimension_numbers=(((1,), (1,)), ((), ())),
        preferred_element_type=jnp.float32)                   # (1, M)


# --------------------------------------------------------------------------
# Wrappers
# --------------------------------------------------------------------------
def pack_head_params(params):
    """One-time fusion of the 5 controller Linears into a (H, CZ+1) slab."""
    wcat = jnp.concatenate([params['wk'], params['wb'], params['wg'],
                            params['ws'], params['wy']], axis=0)          # (H, CZ)
    bcat = jnp.concatenate([params['bk'], params['bb'], params['bg'],
                            params['bs'], params['by']], axis=0).reshape(H, 1)
    return jnp.concatenate([wcat, bcat], axis=1).astype(jnp.float32)      # (H, CZ+1)


@jax.jit
def head_forward_seq(cin_seq, memT, wcatb, w_init):
    """Run T HEAD(read=True) steps in ONE kernel launch.

    Args:
      cin_seq: (T, CZ) controller features per step.
      memT:    (M, N)  memory, transposed once per sequence.
      wcatb:   (H, CZ+1) packed controller weights (pack_head_params).
      w_init:  (1, N)  initial weighting (self.w after reset()).
    Returns:
      reads: (T, M), weights: (T, N).
    """
    T = cin_seq.shape[0]
    cin3 = cin_seq.reshape(T, 1, CZ).astype(jnp.float32)

    reads, wts = pl.pallas_call(
        head_seq_kernel,
        out_shape=(jax.ShapeDtypeStruct((T, 1, M), jnp.float32),
                   jax.ShapeDtypeStruct((T, 1, N), jnp.float32)),
        grid_spec=pltpu.PrefetchScalarGridSpec(
            num_scalar_prefetch=0,
            grid=(T,),
            in_specs=[
                pl.BlockSpec((1, 1, CZ), lambda t: (t, 0, 0)),   # per-step cin
                pl.BlockSpec((M, N), lambda t: (0, 0)),          # resident memT
                pl.BlockSpec((H, CZ + 1), lambda t: (0, 0)),     # resident weights
                pl.BlockSpec((1, N), lambda t: (0, 0)),          # initial w
            ],
            out_specs=(
                pl.BlockSpec((1, 1, M), lambda t: (t, 0, 0)),    # reads (lane-dense)
                pl.BlockSpec((1, 1, N), lambda t: (t, 0, 0)),    # weights (lane-dense)
            ),
            scratch_shapes=[pltpu.VMEM((1, N), jnp.float32),     # carried w
                            pltpu.VMEM((1, N), jnp.float32)],    # per-slot |mem|^2
        ),
        compiler_params=pltpu.CompilerParams(
            dimension_semantics=("arbitrary",)),                 # recurrent axis
    )(cin3, memT, wcatb, w_init)
    return reads.reshape(T, M), wts.reshape(T, N)


def head_forward(cin, memT, wcatb, w_prev):
    """Single-step convenience matching HEAD.forward (read=True)."""
    reads, wts = head_forward_seq(cin.reshape(1, CZ), memT, wcatb,
                                  w_prev.reshape(1, N))
    return reads[0], wts[0]


# --------------------------------------------------------------------------
# Pure-JAX reference mirroring the PyTorch forward (read=True)
# --------------------------------------------------------------------------
def _lin(w, b_, x):
    return jnp.sum(w * x[None, :], axis=1) + b_


def head_step_ref(cin, mem, w_prev, params):
    cin = cin.astype(jnp.float32)
    k = _lin(params['wk'], params['bk'], cin)                        # (M,)
    b = jax.nn.softplus(_lin(params['wb'], params['bb'], cin))       # (1,)
    g = jax.nn.sigmoid(_lin(params['wg'], params['bg'], cin))        # (1,)
    s = jax.nn.softmax(_lin(params['ws'], params['bs'], cin))        # (3,)
    y = jax.nn.softplus(_lin(params['wy'], params['by'], cin)) + 1.0 # (1,)

    eps = 1e-8
    num = jnp.sum(mem * k[None, :], axis=1)                          # (N,)
    den = jnp.maximum(jnp.sqrt(jnp.sum(mem * mem, axis=1) * jnp.sum(k * k)), eps)
    wc = jax.nn.softmax((num / den) * b)                             # (N,)
    wgt = wc * g + (1.0 - g) * w_prev
    wm = jnp.roll(wgt, -1)
    wp = jnp.roll(wgt, 1)
    wt = s[0] * wm + s[1] * wgt + s[2] * wp
    wt = wt ** y
    wt = wt / jnp.maximum(jnp.sum(jnp.abs(wt)), 1e-12)
    read = jnp.sum(mem * wt[:, None], axis=0)                        # (M,)
    return read, wt


def head_seq_ref(cin_seq, mem, params):
    w = params['w']
    reads, wts = [], []
    for t in range(cin_seq.shape[0]):
        r, w = head_step_ref(cin_seq[t], mem, w, params)
        reads.append(r)
        wts.append(w)
    return jnp.stack(reads), jnp.stack(wts)


# --------------------------------------------------------------------------
if __name__ == "__main__":
    key = jax.random.PRNGKey(0)
    ks = jax.random.split(key, 13)
    bound = 1.0 / np.sqrt(CZ)

    def lin(kw, kb, out_dim):
        # torch nn.Linear layout: weight (out, in), bias (out,)
        w = jax.random.uniform(kw, (out_dim, CZ), jnp.float32, -bound, bound)
        b_ = jax.random.uniform(kb, (out_dim,), jnp.float32, -bound, bound)
        return w, b_

    wk, bk = lin(ks[0], ks[1], M)
    wb, bb = lin(ks[2], ks[3], 1)
    wg, bg = lin(ks[4], ks[5], 1)
    ws, bs = lin(ks[6], ks[7], 3)
    wy, by = lin(ks[8], ks[9], 1)
    ww = jax.random.uniform(ks[10], (N,), jnp.float32)  # self.ww; reset(): self.w = ww

    params = dict(wk=wk, bk=bk, wb=wb, bb=bb, wg=wg, bg=bg,
                  ws=ws, bs=bs, wy=wy, by=by, w=ww)

    T = 8
    cin_seq = jax.random.normal(ks[11], (T, CZ), jnp.float32)
    mem = jax.random.normal(ks[12], (N, M), jnp.float32)

    # One-time (per parameter set / per sequence) prep, hoisted off the step path.
    wcatb = pack_head_params(params)                          # (H, CZ+1)
    memT = jnp.asarray(mem, jnp.float32).T                    # (M, N)
    w_init = params['w'].astype(jnp.float32).reshape(1, N)    # (1, N)

    reads, wts = head_forward_seq(cin_seq, memT, wcatb, w_init)
    jax.block_until_ready((reads, wts))

    reads_ref, wts_ref = head_seq_ref(cin_seq, mem, params)
    np.testing.assert_allclose(np.asarray(wts), np.asarray(wts_ref),
                               rtol=2e-3, atol=1e-5)
    np.testing.assert_allclose(np.asarray(reads), np.asarray(reads_ref),
                               rtol=2e-3, atol=1e-4)
    print("KERNEL_OK")
</pallas_src>

<mosaic_0001>
module attributes {stable_mosaic.version = 11 : i64} {
  func.func @head_seq_kernel(%arg0: i32, %arg1: memref<1x1x32xf32, #tpu.memory_space<vmem>>, %arg2: memref<20x128xf32, #tpu.memory_space<vmem>>, %arg3: memref<26x33xf32, #tpu.memory_space<vmem>>, %arg4: memref<1x128xf32, #tpu.memory_space<vmem>>, %arg5: memref<1x1x20xf32, #tpu.memory_space<vmem>>, %arg6: memref<1x1x128xf32, #tpu.memory_space<vmem>>, %arg7: memref<1x128xf32, #tpu.memory_space<vmem>>, %arg8: memref<1x128xf32, #tpu.memory_space<vmem>>) attributes {dimension_semantics = [#tpu.dimension_semantics<arbitrary>], iteration_bounds = array<i64: 8>, scalar_prefetch = 0 : i64, scratch_operands = 2 : i64, tpu.core_type = #tpu.core_type<tc>, window_params = [{transform_indices = @transform_0, window_bounds = array<i64: 1, 1, 32>}, {pipeline_mode = #tpu.pipeline_mode<synchronous>, transform_indices = @transform_1, window_bounds = array<i64: 20, 128>}, {pipeline_mode = #tpu.pipeline_mode<synchronous>, transform_indices = @transform_2, window_bounds = array<i64: 26, 33>}, {pipeline_mode = #tpu.pipeline_mode<synchronous>, transform_indices = @transform_3, window_bounds = array<i64: 1, 128>}, {transform_indices = @transform_4, window_bounds = array<i64: 1, 1, 20>}, {transform_indices = @transform_5, window_bounds = array<i64: 1, 1, 128>}]} {
    %c0 = arith.constant 0 : index
    %c0_0 = arith.constant 0 : index
    %0 = vector.load %arg2[%c0, %c0_0] : memref<20x128xf32, #tpu.memory_space<vmem>>, vector<20x128xf32>
    %c0_i32 = arith.constant 0 : i32
    %1 = arith.cmpi eq, %arg0, %c0_i32 : i32
    %2 = arith.extui %1 : i1 to i32
    %c0_i32_1 = arith.constant 0 : i32
    %3 = arith.cmpi ne, %2, %c0_i32_1 : i32
    scf.if %3 {
      %c0_38 = arith.constant 0 : index
      %c0_39 = arith.constant 0 : index
      %131 = vector.load %arg4[%c0_38, %c0_39] : memref<1x128xf32, #tpu.memory_space<vmem>>, vector<1x128xf32>
      %c0_40 = arith.constant 0 : index
      %c0_41 = arith.constant 0 : index
      %132 = vector.load %arg7[%c0_40, %c0_41] : memref<1x128xf32, #tpu.memory_space<vmem>>, vector<1x128xf32>
      tpu.vector_store %arg7[%c0_40, %c0_41], %131 {strides = array<i32>} : memref<1x128xf32, #tpu.memory_space<vmem>>, vector<1x128xf32>,
      %133 = arith.mulf %0, %0 : vector<20x128xf32>
      %cst_42 = arith.constant dense<0.000000e+00> : vector<128xf32>
      %134 = vector.multi_reduction <add>, %133, %cst_42 [0] : vector<20x128xf32> to vector<128xf32>
      %135 = vector.shape_cast %134 : vector<128xf32> to vector<1x128xf32>
      %c0_43 = arith.constant 0 : index
      %c0_44 = arith.constant 0 : index
      %136 = vector.load %arg8[%c0_43, %c0_44] : memref<1x128xf32, #tpu.memory_space<vmem>>, vector<1x128xf32>
      tpu.vector_store %arg8[%c0_43, %c0_44], %135 {strides = array<i32>} : memref<1x128xf32, #tpu.memory_space<vmem>>, vector<1x128xf32>,
    } else {
    }
    %c0_2 = arith.constant 0 : index
    %c0_3 = arith.constant 0 : index
    %c0_4 = arith.constant 0 : index
    %4 = vector.load %arg1[%c0_2, %c0_3, %c0_4] : memref<1x1x32xf32, #tpu.memory_space<vmem>>, vector<1x1x32xf32>
    %5 = vector.shape_cast %4 : vector<1x1x32xf32> to vector<1x32xf32>
    %c0_5 = arith.constant 0 : index
    %c0_6 = arith.constant 0 : index
    %6 = vector.load %arg3[%c0_5, %c0_6] : memref<26x33xf32, #tpu.memory_space<vmem>>, vector<26x33xf32>
    %7 = vector.extract_strided_slice %6 {offsets = [0, 0], sizes = [26, 32], strides = [1, 1]} : vector<26x33xf32> to vector<26x32xf32>
    %8 = vector.broadcast %5 : vector<1x32xf32> to vector<26x32xf32>
    %9 = arith.mulf %7, %8 : vector<26x32xf32>
    %cst = arith.constant dense<0.000000e+00> : vector<26xf32>
    %10 = vector.multi_reduction <add>, %9, %cst [1] : vector<26x32xf32> to vector<26xf32>
    %11 = vector.shape_cast %10 : vector<26xf32> to vector<26x1xf32>
    %12 = vector.extract_strided_slice %6 {offsets = [0, 32], sizes = [26, 1], strides = [1, 1]} : vector<26x33xf32> to vector<26x1xf32>
    %13 = arith.addf %11, %12 : vector<26x1xf32>
    %14 = vector.extract_strided_slice %13 {offsets = [0, 0], sizes = [20, 1], strides = [1, 1]} : vector<26x1xf32> to vector<20x1xf32>
    %15 = vector.extract_strided_slice %13 {offsets = [20, 0], sizes = [1, 1], strides = [1, 1]} : vector<26x1xf32> to vector<1x1xf32>
    %cst_7 = arith.constant 0.000000e+00 : f32
    %16 = vector.broadcast %cst_7 : f32 to vector<1x1xf32>
    %17 = arith.maximumf %15, %16 : vector<1x1xf32>
    %18 = vector.broadcast %cst_7 : f32 to vector<1x1xf32>
    %19 = arith.subf %15, %18 : vector<1x1xf32>
    %20 = arith.cmpf one, %19, %19 : vector<1x1xf32>
    %21 = vector.broadcast %cst_7 : f32 to vector<1x1xf32>
    %22 = arith.addf %15, %21 : vector<1x1xf32>
    %23 = math.absf %19 : vector<1x1xf32>
    %cst_8 = arith.constant 0.000000e+00 : f32
    %24 = vector.broadcast %cst_8 : f32 to vector<1x1xf32>
    %25 = arith.subf %24, %23 : vector<1x1xf32>
    %26 = math.exp %25 : vector<1x1xf32>
    %27 = math.log1p %26 : vector<1x1xf32>
    %28 = arith.addf %17, %27 : vector<1x1xf32>
    %29 = arith.select %20, %22, %28 : vector<1x1xi1>, vector<1x1xf32>
    %30 = vector.extract_strided_slice %13 {offsets = [21, 0], sizes = [1, 1], strides = [1, 1]} : vector<26x1xf32> to vector<1x1xf32>
    %31 = arith.negf %30 : vector<1x1xf32>
    %32 = math.exp %31 : vector<1x1xf32>
    %cst_9 = arith.constant 1.000000e+00 : f32
    %33 = vector.broadcast %cst_9 : f32 to vector<1x1xf32>
    %34 = arith.addf %33, %32 : vector<1x1xf32>
    %35 = arith.divf %33, %34 : vector<1x1xf32>
    %36 = vector.extract_strided_slice %13 {offsets = [22, 0], sizes = [3, 1], strides = [1, 1]} : vector<26x1xf32> to vector<3x1xf32>
    %37 = vector.extract_strided_slice %13 {offsets = [25, 0], sizes = [1, 1], strides = [1, 1]} : vector<26x1xf32> to vector<1x1xf32>
    %cst_10 = arith.constant 0.000000e+00 : f32
    %38 = vector.broadcast %cst_10 : f32 to vector<1x1xf32>
    %39 = arith.maximumf %37, %38 : vector<1x1xf32>
    %40 = vector.broadcast %cst_10 : f32 to vector<1x1xf32>
    %41 = arith.subf %37, %40 : vector<1x1xf32>
    %42 = arith.cmpf one, %41, %41 : vector<1x1xf32>
    %43 = vector.broadcast %cst_10 : f32 to vector<1x1xf32>
    %44 = arith.addf %37, %43 : vector<1x1xf32>
    %45 = math.absf %41 : vector<1x1xf32>
    %cst_11 = arith.constant 0.000000e+00 : f32
    %46 = vector.broadcast %cst_11 : f32 to vector<1x1xf32>
    %47 = arith.subf %46, %45 : vector<1x1xf32>
    %48 = math.exp %47 : vector<1x1xf32>
    %49 = math.log1p %48 : vector<1x1xf32>
    %50 = arith.addf %39, %49 : vector<1x1xf32>
    %51 = arith.select %42, %44, %50 : vector<1x1xi1>, vector<1x1xf32>
    %cst_12 = arith.constant 1.000000e+00 : f32
    %52 = vector.broadcast %cst_12 : f32 to vector<1x1xf32>
    %53 = arith.addf %51, %52 : vector<1x1xf32>
    %cst_13 = arith.constant dense<0xFF800000> : vector<1xf32>
    %54 = vector.multi_reduction <maximumf>, %36, %cst_13 [0] : vector<3x1xf32> to vector<1xf32>
    %55 = vector.shape_cast %54 : vector<1xf32> to vector<1x1xf32>
    %56 = vector.broadcast %55 : vector<1x1xf32> to vector<3x1xf32>
    %57 = arith.subf %36, %56 : vector<3x1xf32>
    %58 = math.exp %57 : vector<3x1xf32>
    %cst_14 = arith.constant dense<0.000000e+00> : vector<1xf32>
    %59 = vector.multi_reduction <add>, %58, %cst_14 [0] : vector<3x1xf32> to vector<1xf32>
    %60 = vector.shape_cast %59 : vector<1xf32> to vector<1x1xf32>
    %61 = vector.broadcast %60 : vector<1x1xf32> to vector<3x1xf32>
    %62 = arith.divf %58, %61 : vector<3x1xf32>
    %63 = vector.broadcast %14 : vector<20x1xf32> to vector<20x128xf32>
    %64 = arith.mulf %0, %63 : vector<20x128xf32>
    %cst_15 = arith.constant dense<0.000000e+00> : vector<128xf32>
    %65 = vector.multi_reduction <add>, %64, %cst_15 [0] : vector<20x128xf32> to vector<128xf32>
    %66 = vector.shape_cast %65 : vector<128xf32> to vector<1x128xf32>
    %67 = arith.mulf %14, %14 : vector<20x1xf32>
    %cst_16 = arith.constant dense<0.000000e+00> : vector<1xf32>
    %68 = vector.multi_reduction <add>, %67, %cst_16 [0] : vector<20x1xf32> to vector<1xf32>
    %69 = vector.shape_cast %68 : vector<1xf32> to vector<1x1xf32>
    %c0_17 = arith.constant 0 : index
    %c0_18 = arith.constant 0 : index
    %70 = vector.load %arg8[%c0_17, %c0_18] : memref<1x128xf32, #tpu.memory_space<vmem>>, vector<1x128xf32>
    %71 = vector.broadcast %69 : vector<1x1xf32> to vector<1x128xf32>
    %72 = arith.mulf %70, %71 : vector<1x128xf32>
    %cst_19 = arith.constant 9.99999993E-9 : f32
    %cst_20 = arith.constant 9.99999993E-9 : f32
    %73 = arith.mulf %cst_19, %cst_20 : f32
    %74 = vector.broadcast %73 : f32 to vector<1x128xf32>
    %75 = arith.maximumf %72, %74 : vector<1x128xf32>
    %76 = math.rsqrt %75 : vector<1x128xf32>
    %77 = arith.mulf %66, %76 : vector<1x128xf32>
    %78 = vector.broadcast %29 : vector<1x1xf32> to vector<1x128xf32>
    %79 = arith.mulf %77, %78 : vector<1x128xf32>
    %cst_21 = arith.constant dense<0xFF800000> : vector<1xf32>
    %80 = vector.multi_reduction <maximumf>, %79, %cst_21 [1] : vector<1x128xf32> to vector<1xf32>
    %81 = vector.shape_cast %80 : vector<1xf32> to vector<1x1xf32>
    %82 = vector.broadcast %81 : vector<1x1xf32> to vector<1x128xf32>
    %83 = arith.subf %79, %82 : vector<1x128xf32>
    %84 = math.exp %83 : vector<1x128xf32>
    %cst_22 = arith.constant dense<0.000000e+00> : vector<1xf32>
    %85 = vector.multi_reduction <add>, %84, %cst_22 [1] : vector<1x128xf32> to vector<1xf32>
    %86 = vector.shape_cast %85 : vector<1xf32> to vector<1x1xf32>
    %87 = vector.broadcast %86 : vector<1x1xf32> to vector<1x128xf32>
    %88 = arith.divf %84, %87 : vector<1x128xf32>
    %c0_23 = arith.constant 0 : index
    %c0_24 = arith.constant 0 : index
    %89 = vector.load %arg7[%c0_23, %c0_24] : memref<1x128xf32, #tpu.memory_space<vmem>>, vector<1x128xf32>
    %90 = vector.broadcast %35 : vector<1x1xf32> to vector<1x128xf32>
    %91 = arith.mulf %88, %90 : vector<1x128xf32>
    %cst_25 = arith.constant 1.000000e+00 : f32
    %92 = vector.broadcast %cst_25 : f32 to vector<1x1xf32>
    %93 = arith.subf %92, %35 : vector<1x1xf32>
    %94 = vector.broadcast %93 : vector<1x1xf32> to vector<1x128xf32>
    %95 = arith.mulf %94, %89 : vector<1x128xf32>
    %96 = arith.addf %91, %95 : vector<1x128xf32>
    %c127_i32 = arith.constant 127 : i32
    %97 = tpu.dynamic_rotate %96 by %c127_i32 dim 1 : vector<1x128xf32>, i32 -> vector<1x128xf32>
    %c1_i32 = arith.constant 1 : i32
    %98 = tpu.dynamic_rotate %96 by %c1_i32 dim 1 : vector<1x128xf32>, i32 -> vector<1x128xf32>
    %99 = vector.extract_strided_slice %62 {offsets = [0, 0], sizes = [1, 1], strides = [1, 1]} : vector<3x1xf32> to vector<1x1xf32>
    %100 = vector.broadcast %99 : vector<1x1xf32> to vector<1x128xf32>
    %101 = arith.mulf %100, %97 : vector<1x128xf32>
    %102 = vector.extract_strided_slice %62 {offsets = [1, 0], sizes = [1, 1], strides = [1, 1]} : vector<3x1xf32> to vector<1x1xf32>
    %103 = vector.broadcast %102 : vector<1x1xf32> to vector<1x128xf32>
    %104 = arith.mulf %103, %96 : vector<1x128xf32>
    %105 = arith.addf %101, %104 : vector<1x128xf32>
    %106 = vector.extract_strided_slice %62 {offsets = [2, 0], sizes = [1, 1], strides = [1, 1]} : vector<3x1xf32> to vector<1x1xf32>
    %107 = vector.broadcast %106 : vector<1x1xf32> to vector<1x128xf32>
    %108 = arith.mulf %107, %98 : vector<1x128xf32>
    %109 = arith.addf %105, %108 : vector<1x128xf32>
    %cst_26 = arith.constant 1.000000e-30 : f32
    %110 = vector.broadcast %cst_26 : f32 to vector<1x128xf32>
    %111 = arith.maximumf %109, %110 : vector<1x128xf32>
    %112 = math.log %111 : vector<1x128xf32>
    %113 = vector.broadcast %53 : vector<1x1xf32> to vector<1x128xf32>
    %114 = arith.mulf %113, %112 : vector<1x128xf32>
    %115 = math.exp %114 : vector<1x128xf32>
    %116 = math.absf %115 : vector<1x128xf32>
    %cst_27 = arith.constant dense<0.000000e+00> : vector<1xf32>
    %117 = vector.multi_reduction <add>, %116, %cst_27 [1] : vector<1x128xf32> to vector<1xf32>
    %118 = vector.shape_cast %117 : vector<1xf32> to vector<1x1xf32>
    %cst_28 = arith.constant 9.99999996E-13 : f32
    %119 = vector.broadcast %cst_28 : f32 to vector<1x1xf32>
    %120 = arith.maximumf %118, %119 : vector<1x1xf32>
    %121 = vector.broadcast %120 : vector<1x1xf32> to vector<1x128xf32>
    %122 = arith.divf %115, %121 : vector<1x128xf32>
    %c0_29 = arith.constant 0 : index
    %c0_30 = arith.constant 0 : index
    %123 = vector.load %arg7[%c0_29, %c0_30] : memref<1x128xf32, #tpu.memory_space<vmem>>, vector<1x128xf32>
    tpu.vector_store %arg7[%c0_29, %c0_30], %122 {strides = array<i32>} : memref<1x128xf32, #tpu.memory_space<vmem>>, vector<1x128xf32>,
    %c0_31 = arith.constant 0 : index
    %c0_32 = arith.constant 0 : index
    %c0_33 = arith.constant 0 : index
    %124 = vector.load %arg6[%c0_31, %c0_32, %c0_33] : memref<1x1x128xf32, #tpu.memory_space<vmem>>, vector<1x1x128xf32>
    %125 = vector.shape_cast %124 : vector<1x1x128xf32> to vector<1x128xf32>
    %126 = vector.shape_cast %122 : vector<1x128xf32> to vector<1x1x128xf32>
    tpu.vector_store %arg6[%c0_31, %c0_32, %c0_33], %126 {strides = array<i32>} : memref<1x1x128xf32, #tpu.memory_space<vmem>>, vector<1x1x128xf32>,
    %cst_34 = arith.constant dense<0.000000e+00> : vector<1x20xf32>
    %127 = tpu.matmul %122, %0, %cst_34 {dimension_numbers = #tpu.dot_dimension_numbers<[1], [1], [0], [0], [0, 0, 1, 0], [], []>} : vector<1x128xf32>, vector<20x128xf32>, vector<1x20xf32> -> vector<1x20xf32>
    %c0_35 = arith.constant 0 : index
    %c0_36 = arith.constant 0 : index
    %c0_37 = arith.constant 0 : index
    %128 = vector.load %arg5[%c0_35, %c0_36, %c0_37] : memref<1x1x20xf32, #tpu.memory_space<vmem>>, vector<1x1x20xf32>
    %129 = vector.shape_cast %128 : vector<1x1x20xf32> to vector<1x20xf32>
    %130 = vector.shape_cast %127 : vector<1x20xf32> to vector<1x1x20xf32>
    tpu.vector_store %arg5[%c0_35, %c0_36, %c0_37], %130 {strides = array<i32>} : memref<1x1x20xf32, #tpu.memory_space<vmem>>, vector<1x1x20xf32>,
    return
  }
  func.func @transform_0(%arg0: i32) -> (i32, i32, i32) {
    %c0_i32 = arith.constant 0 : i32
    %c0_i32_0 = arith.constant 0 : i32
    %c0_i32_1 = arith.constant 0 : i32
    return %arg0, %c0_i32, %c0_i32_0 : i32, i32, i32
  }
  func.func @transform_1(%arg0: i32) -> (i32, i32) {
    %c0_i32 = arith.constant 0 : i32
    %c0_i32_0 = arith.constant 0 : i32
    %c0_i32_1 = arith.constant 0 : i32
    return %c0_i32, %c0_i32_0 : i32, i32
  }
  func.func @transform_2(%arg0: i32) -> (i32, i32) {
    %c0_i32 = arith.constant 0 : i32
    %c0_i32_0 = arith.constant 0 : i32
    %c0_i32_1 = arith.constant 0 : i32
    return %c0_i32, %c0_i32_0 : i32, i32
  }
  func.func @transform_3(%arg0: i32) -> (i32, i32) {
    %c0_i32 = arith.constant 0 : i32
    %c0_i32_0 = arith.constant 0 : i32
    %c0_i32_1 = arith.constant 0 : i32
    return %c0_i32, %c0_i32_0 : i32, i32
  }
  func.func @transform_4(%arg0: i32) -> (i32, i32, i32) {
    %c0_i32 = arith.constant 0 : i32
    %c0_i32_0 = arith.constant 0 : i32
    %c0_i32_1 = arith.constant 0 : i32
    return %arg0, %c0_i32, %c0_i32_0 : i32, i32, i32
  }
  func.func @transform_5(%arg0: i32) -> (i32, i32, i32) {
    %c0_i32 = arith.constant 0 : i32
    %c0_i32_0 = arith.constant 0 : i32
    %c0_i32_1 = arith.constant 0 : i32
    return %arg0, %c0_i32, %c0_i32_0 : i32, i32, i32
  }
}

</mosaic_0001>

<bundles_post_ra>
// kernel: head_forward_seq.1
= control target key start
LH: loop header
LB: loop body
LE: loop exit
PB: predicated region body
PF: predicated region fallthrough
CT: control target
= control target key end

     0   :  { %11 = vsyncpa [#allocation5], 0  ;;  %s1455_s0 = inlined_call_operand.hbm [shape: f32[8,1,32], index: 0, kind: input, shape index: {}]   ;;  %s1456_s1 = inlined_call_operand.hbm [shape: f32[20,128], index: 1, kind: input, shape index: {}]   ;;  %s1457_s2 = inlined_call_operand.hbm [shape: f32[26,33], index: 2, kind: input, shape index: {}]   ;;  %s1458_s3 = inlined_call_operand.vmem [shape: f32[1,128], index: 3, kind: input, shape index: {}]   ;;  %s1459_s4 = inlined_call_operand.hbm [shape: f32[8,1,20], index: 4, kind: output, shape index: {0}]   ;;  %s1460_s5 = inlined_call_operand.hbm [shape: f32[8,1,128], index: 5, kind: output, shape index: {1}]  }
   0x1   :  { %13 = vsyncpa [#allocation5 + $0x1], 0 }
   0x2   :  { %14 = vsyncpa [#allocation8], 0 }
   0x3   :  { %15 = vsyncpa [#allocation6], 0 }
   0x4   :  { %17 = vsyncpa [#allocation6 + $0x1], 0 }
   0x5   :  { %18 = vsyncpa [#allocation12], 0 }
   0x6   :  { %20 = vsyncpa [#allocation12 + $0x1], 0  ;;  %s1155_s18 = smov 0   ;;  %s1157_s19 = smov 0  }
   0x7   :  { %s1159_s20 = smov 0   ;;  %s1161_s21 = smov 0  }
   0x8 LB: > { %s1176_s22 = sadd.s32 4294967295, %s1110_s21   ;;  %s777_s23 = sadd.s32 4294967294, %s1110_s21   ;;  %s1110_s21 = sphi %s1161_s21, %s1480_s21   ;;  %s1106_s20 = sphi %s1159_s20, %s1479_s20   ;;  %s1102_s19 = sphi %s1157_s19, %s1478_s19   ;;  %s1098_s18 = sphi %s1155_s18, %s1477_s18  }
   0x9   : > { %p46_p0 = scmp.ne.s32.totalorder %s1102_s19, %s1098_s18  ;;  %p1461_p1 = scmp.eq.s32.totalorder %s1176_s22, 0 }
   0xa   : > { %p139_p3 = scmp.eq.s32.totalorder %s777_s23, 7  ;;  %p778_p5 = scmp.ge.s32.totalorder %s1110_s21, 1 }
   0xb   : > { %p1185_p4 = por %p1461_p1, %p46_p0  ;;  %p172_p7 = scmp.lt.s32.totalorder %s1110_s21, 9 }
   0xc   : > { %p1190_p6 = por %p139_p3, %p46_p0  ;;  %s1112_s27 = smov [#allocation7]  }
   0xd   : > { %s1464_s24 = scalar_select %p1185_p4, 1, 0 }
   0xe   : > { %s1465_s25 = scalar_select %p1190_p6, 1, 0 }
   0xf   : > { %p1196_p9 = pnand %p778_p5, %p172_p7  ;;  %s184_s28 = sshll.u32 %s1112_s27, 4  ;;  %s185_s28 = int_to_ptr.vmem [resolvable:$true] %s184_s28 }
  0x10   : > { %s1113_s30 = smov [#allocation9]   ;;  %s922_s9 = scalar_lea.hbm %s1456_s1, 384 }
  0x11   : > { %s1466_s26 = scalar_select %p1196_p9, 1, 0 }
  0x12   : > { %p824_p10 = pneg %p1196_p9  ;;  %s197_s6 = sshll.u32 %s1113_s30, 4  ;;  %s1208_s6 = int_to_ptr.vmem [resolvable:$true] %s197_s6 }
  0x13   : > { %p923_p12 = scmp.ne.s32.totalorder %s1456_s1, %s922_s9  ;;  %p929_p5 = scmp.lt.u32.totalorder %s922_s9, %s1456_s1 }
  0x14   : > { %p1204_p11 = pnand %p824_p10, %p1461_p1 }
  0x16   : > { %p924_p13 = pneg %p1204_p11 }
  0x18   : > { %p925_p0 = pnand %p924_p13, %p923_p12 }
  0x1a   : > { %p926_p3 = pneg %p925_p0 }
  0x1c   : > { %p931_p7 = pnand %p929_p5, %p926_p3 }
  0x1e   : > { %934 = shalt.err (!%p931_p7)
}
  0x1f   : > { %s935_s14 = scalar_lea.vmem %s185_s28, 384  ;;  %p943_p2 = scmp.lt.s32.totalorder %s185_s28, %s185_s28 }
  0x20   : > { %p936_p10 = scmp.ne.s32.totalorder %s185_s28, %s935_s14  ;;  %p944_p6 = scmp.lt.s32.totalorder %s935_s14, %s935_s14 }
  0x22   : > { %p938_p8 = pnand %p936_p10, %p924_p13  ;;  %p945_p4 = por %p944_p6, %p943_p2 }
  0x24   : > { %p939_p1 = pneg %p938_p8 }
  0x26   : > { %p946_p9 = pnand %p945_p4, %p939_p1 }
  0x28   : > { %949 = shalt.err (!%p946_p9)
}
  0x29   : > { %s1114_s15 = smov 128   ;;  %s1115_s16 = smov 8  }
  0x2a   : > { %827 = dma.hbm_to_vmem [thread:$0]  (!%p1204_p11), %s1456_s1, 384, %s185_s28, [#allocation8], %s1114_s15, %s1114_s15, %s1115_s16  }
  0x2b   : > { %s950_s7 = scalar_lea.hbm %s1457_s2, 512 }
  0x2c   : > { %p951_p8 = scmp.ne.s32.totalorder %s1457_s2, %s950_s7  ;;  %p957_p4 = scmp.lt.u32.totalorder %s950_s7, %s1457_s2 }
  0x2e   : > { %p953_p1 = pnand %p951_p8, %p924_p13 }
  0x30   : > { %p954_p2 = pneg %p953_p1 }
  0x32   : > { %p959_p6 = pnand %p957_p4, %p954_p2 }
  0x34   : > { %962 = shalt.err (!%p959_p6)
}
  0x35   : > { %s963_s28 = scalar_lea.vmem %s1208_s6, 512  ;;  %p971_p3 = scmp.lt.s32.totalorder %s1208_s6, %s1208_s6 }
  0x36   : > { %p964_p9 = scmp.ne.s32.totalorder %s1208_s6, %s963_s28  ;;  %p972_p5 = scmp.lt.s32.totalorder %s963_s28, %s963_s28 }
  0x38   : > { %p966_p12 = pnand %p964_p9, %p924_p13  ;;  %p973_p7 = por %p972_p5, %p971_p3 }
  0x3a   : > { %p967_p0 = pneg %p966_p12 }
  0x3c   : > { %p974_p10 = pnand %p973_p7, %p967_p0 }
  0x3e   : > { %977 = shalt.err (!%p974_p10)
}
  0x3f   : > { %830 = dma.hbm_to_vmem [thread:$0]  (!%p1204_p11), %s1457_s2, 512, %s1208_s6, [#allocation8], %s1114_s15, %s1114_s15, %s1115_s16  }
  0x40   : > { %s1258_s14 = sadd.s32 1, %s1110_s21   ;;  %s33_s29 = sadd.s32 1, %s1106_s20 }
  0x41   : > { %s30_s17 = ssub.s32 %s1110_s21, %s1258_s14  ;;  %p40_p13 = scmp.ne.s32.totalorder %s1106_s20, %s1102_s19 }
  0x42   : > { %p31_p8 = scmp.eq.s32.totalorder %s30_s17, 0  ;;  %p41_p1 = scmp.eq.s32.totalorder %s1110_s21, 0 }
  0x43   : > { %p1468_p2 = scmp.eq.s32.totalorder %s1176_s22, 7  ;;  %p844_p6 = scmp.lt.s32.totalorder %s1110_s21, 8 }
  0x44   : > { %s1274_s27 = scalar_select %p31_p8, %s1106_s20, %s33_s29  }
  0x45   : > { %p1268_p4 = por %p1468_p2, %p40_p13  ;;  %p42_p9 = por %p41_p1, %p40_p13 }
  0x46   : > { %s214_s30 = sand.u32 1, %s1106_s20   ;;  %s782_s7 = sshll.u32 %s1110_s21, 4 }
  0x47   : > { %s217_s6 = scalar_lea.vmem [#allocation4], %s214_s30  ;;  %s1281_s9 = scalar_lea.hbm %s1455_s0, %s782_s7 }
  0x48   : > { %s224_s15 = sshll.u32 %s217_s6, 4  ;;  %p1285_p11 = pnand %p844_p6, %p42_p9  ;;  %s1283_s15 = int_to_ptr.vmem [resolvable:$true] %s224_s15 }
  0x49   : > { %s215_s11 = scalar_lea.sflag [#allocation5], %s214_s30  ;;  %s978_s28 = scalar_lea.hbm %s1281_s9, 16 }
  0x4a   : > { %p979_p12 = scmp.ne.s32.totalorder %s1281_s9, %s978_s28  ;;  %p980_p0 = pneg %p1285_p11 }
  0x4b   : > { %s983_s29 = scalar_lea.hbm %s1455_s0, 128  ;;  %p984_p7 = scmp.lt.u32.totalorder %s1281_s9, %s1455_s0 }
  0x4c   : > { %p981_p3 = pnand %p980_p0, %p979_p12  ;;  %p985_p10 = scmp.lt.u32.totalorder %s983_s29, %s978_s28 }
  0x4d   : > { %p987_p8 = scmp.lt.u32.totalorder %s978_s28, %s1281_s9 }
  0x4e   : > { %p982_p5 = pneg %p981_p3  ;;  %p986_p13 = por %p985_p10, %p984_p7 }
  0x50   : > { %p988_p1 = por %p987_p8, %p986_p13 }
  0x52   : > { %p989_p2 = pnand %p988_p1, %p982_p5 }
  0x54   : > { %992 = shalt.err (!%p989_p2)
}
  0x55   : > { %s993_s30 = scalar_lea.vmem %s1283_s15, 16  ;;  %s1116_s6 = smov [#allocation4]  }
  0x56   : > { %p994_p6 = scmp.ne.s32.totalorder %s1283_s15, %s993_s30  ;;  %s998_s16 = sshll.u32 %s1116_s6, 4  ;;  %s999_s16 = int_to_ptr.vmem [resolvable:$false] %s998_s16 }
  0x57   : > { %s1000_s8 = scalar_lea.vmem %s999_s16, 32  ;;  %p1001_p3 = scmp.lt.s32.totalorder %s1283_s15, %s999_s16 }
  0x58   : > { %p996_p9 = pnand %p994_p6, %p980_p0  ;;  %p1002_p7 = scmp.lt.s32.totalorder %s1000_s8, %s993_s30 }
  0x5a   : > { %p997_p12 = pneg %p996_p9  ;;  %p1003_p10 = por %p1002_p7, %p1001_p3 }
  0x5c   : > { %p1004_p13 = pnand %p1003_p10, %p997_p12 }
  0x5e   : > { %1007 = shalt.err (!%p1004_p13)
}
  0x5f   : > { %834 = dma.hbm_to_vmem [thread:$0]  (!%p1285_p11), %s1281_s9, 16, %s1283_s15, %s215_s11  }
  0x60   : > { %p1471_p5 = scmp.ne.s32.totalorder %s1466_s26, 0 }
  0x61   : > { %s1317_s28 = sand.u32 (!%p1471_p5), 1, %s1102_s19   ;;  %p1472_p0 = scmp.ne.s32.totalorder (!%p1471_p5), %s1464_s24, 0 }
  0x62   : > { %233 = sbr.rel (%p1471_p5) target bundleno = 1311 (0x51f), region = 36  ;;  %s236_s12 = scalar_lea.sflag (!%p1471_p5), [#allocation5], %s1317_s28 }
  0x63   : > { %s238_s13 = scalar_lea.vmem (!%p1471_p5), [#allocation4], %s1317_s28 }
  0x69   : > { %1081 = dma.done.wait (%p1472_p0), %s236_s12, 16  }
  0x6a   : > { %1083 = vsyncadd (%p1472_p0), %s236_s12, 4294967280  ;;  %p1473_p8 = scmp.eq.s32.totalorder %s1176_s22, 0 }
  0x6c   : > { %1085 = dma.done.wait (%p1473_p8), [#allocation8], 896   ;;  %p1474_p11 = pmov %p1473_p8 }
  0x6d   : > { %v1329_v0 = vld [vmem:[#allocation7] sm:$0xff]  ;;  %v1331_v1 = vld [vmem:[#allocation7 + $0x8] sm:$0xff]  ;;  %v1333_v2 = vld [vmem:[#allocation7 + $0x10] sm:$0xf]  ;;  %s268_s26 = scalar_lea.vmem [#allocation10], %s1317_s28  ;;  %s274_s15 = scalar_lea.vmem [#allocation11], %s1317_s28 }
  0x6e   : > { %1087 = vsyncadd (%p1474_p11), [#allocation8], 4294966400  ;;  %p1475_p1 = scmp.ne.s32.totalorder %s1176_s22, 0 }
  0x6f   : > { %v282_v3 = vld [vmem:[%s1458_s3] sm:$0x1] (!%p1475_p1)  ;;  %v284_v4 = vmul.f32 (!%p1475_p1), %v1329_v0, %v1329_v0  ;;  %v285_v5 = vmul.f32 (!%p1475_p1), %v1331_v1, %v1331_v1  ;;  %v286_v6 = vmul.f32 (!%p1475_p1), %v1333_v2, %v1333_v2  ;;  %vm288_vm0 = vcmask (!%p1475_p1), 1043456  }
  0x70   : > { %281 = sbr.rel (%p1475_p1) target bundleno = 130 (0x82), region = 52  ;;  %283 = vst [vmem:[#allocation2] sm:$0x1] (!%p1475_p1), %v282_v3 }
  0x71   : > { %v287_v7 = vadd.f32 (!%p1475_p1), %v285_v5, %v284_v4  ;;  %v289_v8 = vsel (!%p1475_p1), %vm288_vm0, %v286_v6, 0.0 }
  0x73   : > { %v290_v9 = vadd.f32 (!%p1475_p1), %v289_v8, %v287_v7 }
  0x75   : > { %v291_v10 = vrot.slane (!%p1475_p1), %v290_v9, 4 }
  0x77   : > { %v292_v11 = vadd.f32 %v291_v10, %v290_v9 }
  0x79   : > { %v293_v12 = vrot.slane %v292_v11, 2 }
  0x7b   : > { %v294_v13 = vadd.f32 %v293_v12, %v292_v11 }
  0x7d   : > { %v295_v14 = vrot.slane %v294_v13, 1 }
  0x7f   : > { %v296_v15 = vadd.f32 %v295_v14, %v294_v13 }
  0x81   : > { %297 = vst [vmem:[#allocation3] sm:$0x1] %v296_v15 }
  0x82 PF: > { %v787_v16 = vld [vmem:[%s238_s13] ss:$0 sm:$0xff]  ;;  %v301_v17 = vld [vmem:[#allocation9 + $0x10] sm:$0xff]  ;;  %vm313_vm1 = vcmask 261120   ;;  %v300_v18 = vld [vmem:[#allocation9 + $0x8] sm:$0xff]  ;;  %v1117_v26 = vmov 32  }
  0x83   : > { %v311_v19 = vmul.f32 %v787_v16, %v301_v17  ;;  %v310_v20 = vmul.f32 %v787_v16, %v300_v18  ;;  %v299_v21 = vld [vmem:[#allocation9] sm:$0xff]  ;;  %891 = vset.pattern.permute.xlu0 %v1117_v26  ;;  %890 = vset.pattern.permute.xlu1 %v1117_v26  ;;  %vm440_vm2 = vcmask 269568   ;;  %vm444_vm3 = vcmask 265472   ;;  %v302_v53 = vld [vmem:[#allocation9 + $0x18] sm:$0x3]  ;;  %s1118_s10 = smov 127  }
  0x84   : > { %v309_v22 = vmul.f32 %v787_v16, %v299_v21  ;;  %v312_v55 = vmul.f32 %v787_v16, %v302_v53  ;;  %vm323_vm4 = vcmask 254976   ;;  %vm428_vm7 = vcmask 1043456   ;;  %s1119_s11 = smov 1   ;;  %s790_s29 = sshll.u32 %s1176_s22, 4 }
  0x85   : > { %v320_v23 = vsel %vm313_vm1, %v311_v19, 0.0  ;;  %v317_v24 = vsel %vm313_vm1, %v310_v20, 0.0  ;;  %vm470_vm8 = vcmask 1040384   ;;  %vm376_vm11 = vcmask 262400   ;;  %s1381_s30 = scalar_lea.hbm %s1460_s5, %s790_s29  ;;  %s667_s6 = sshll.u32 %s274_s15, 4  ;;  %s668_s6 = int_to_ptr.vmem [resolvable:$true] %s667_s6 }
  0x86   : > { %321 = vadd.xlane.f32.xlu0 %v320_v23  ;;  %318 = vadd.xlane.f32.xlu1 %v317_v24  ;;  %v314_v25 = vsel %vm313_vm1, %v309_v22, 0.0  ;;  %v324_v58 = vsel %vm323_vm4, %v312_v55, 0.0  ;;  %vm374_vm12 = vcmask 269574   ;;  %vm393_vm13 = vcmask 1041408   ;;  %s642_s16 = scalar_lea.sflag [#allocation12], %s1317_s28  ;;  %s1008_s8 = scalar_lea.vmem %s668_s6, 16 }
  0x87   : > { %vm398_vm14 = vcmask 264448   ;;  %vm553_vm15 = vcmask 1041409   ;;  %vm1121_vm0 = vmmov 0   ;;  %p1009_p2 = scmp.ne.s32.totalorder %s668_s6, %s1008_s8  ;;  %s1123_s12 = smov [#allocation11]  }
  0x88   : > { %v453_v20 = vld [vmem:[#allocation3] sm:$0x1]  ;;  %s1012_s13 = sshll.u32 %s1123_s12, 4  ;;  %s1013_s13 = int_to_ptr.vmem [resolvable:$false] %s1012_s13 }
  0x89   : > { %p1010_p6 = pnand %p1009_p2, %p1268_p4  ;;  %s1014_s24 = scalar_lea.vmem %s1013_s13, 32 }
  0x8a   : > { %315 = vadd.xlane.f32.xlu0 %v314_v25  ;;  %p1015_p12 = scmp.lt.s32.totalorder %s668_s6, %s1013_s13  ;;  %p1016_p3 = scmp.lt.s32.totalorder %s1014_s24, %s1008_s8 }
  0x8b   : > { %p1011_p9 = pneg %p1010_p6 }
  0x8c   : > { %p1017_p7 = por %p1016_p3, %p1015_p12 }
  0x8e   : > { %p1018_p10 = pnand %p1017_p7, %p1011_p9 }
 0x113   : > { %v322_v27 = vpop.xlane.xlu0 %321  ;;  %v319_v28 = vpop.xlane.xlu1 %318 }
 0x114   : > { %v1348_v29 = vadd.f32 %v322_v27, %v301_v17  ;;  %v328_v30 = vadd.f32 %v319_v28, %v300_v18 }
 0x116   : > { %v334_v31 = vand.u32 2147483647, %v1348_v29  ;;  %v438_v32 = vmul.f32 %v328_v30, %v328_v30  ;;  %416 = vperm.xlu0 %891, %v328_v30   ;;  %v439_v38 = vmul.f32 %v1348_v29, %v1348_v29  ;;  %v788_v50 = vmul.f32 -1.442695, %v1348_v29 }
 0x117   : > { %v316_v33 = vpop.xlane.xlu0 %315  ;;  %v331_v63 = vmax.f32 %v1348_v29, 0.0  ;;  %vm332_vm6 = vcmp.ne.f32.partialorder %v1348_v29, %v1348_v29 }
 0x118   : > { %v335_v34 = vsub.f32 0.0, %v334_v31  ;;  %v327_v35 = vadd.f32 %v316_v33, %v299_v21  ;;  %v442_v37 = vsel %vm440_vm2, %v438_v32, 0.0  ;;  %v445_v42 = vsel %vm444_vm3, %v439_v38, 0.0 }
 0x11a   : > { %v336_v36 = vmul.f32 1.442695, %v335_v34  ;;  %v437_v39 = vmul.f32 %v327_v35, %v327_v35  ;;  %411 = vperm.xlu1 %890, %v327_v35  }
 0x11c   : > { %892 = vpow2.f32 %v336_v36  ;;  %v441_v40 = vsel %vm440_vm2, %v437_v39, 0.0 }
 0x11d   : > { %v443_v41 = vadd.f32 %v442_v37, %v441_v40 }
 0x11e   : > { %421 = vperm.xlu1 %890, %v1348_v29  }
 0x11f   : > { %v446_v43 = vadd.f32 %v445_v42, %v443_v41 }
 0x121   : > { %v447_v44 = vrot.slane %v446_v43, 4 }
 0x123   : > { %v448_v45 = vadd.f32 %v447_v44, %v446_v43 }
 0x125   : > { %v449_v46 = vrot.slane %v448_v45, 2 }
 0x126   : > { %v893_v47 = vpop.eup %892 }
 0x127   : > { %v450_v48 = vadd.f32 %v449_v46, %v448_v45  ;;  %v338_v49 = vadd.f32 1.0, %v893_v47  ;;  %v341_v54 = vmul.f32 -0.5, %v893_v47  ;;  %v344_v57 = vand.u32 2147483647, %v893_v47 }
 0x129   : > { %v451_v51 = vrot.slane %v450_v48, 1  ;;  %894 = vlog2.f32 %v338_v49  ;;  %v342_v56 = vadd.f32 1.0, %v341_v54  ;;  %vm345_vm5 = vcmp.lt.f32.partialorder %v344_v57, 0.0004427343 }
 0x12a   : > { %896 = vpow2.f32 %v788_v50  ;;  %v375_v54 = vsel %vm374_vm12, %v1348_v29, -inf }
 0x12b   : > { %v452_v52 = vadd.f32 %v451_v51, %v450_v48  ;;  %v343_v61 = vmul.f32 %v893_v47, %v342_v56 }
 0x12d   : > { %456 = vperm.xlu1 %890, %v452_v52  }
 0x133   : > { %v895_v59 = vpop.eup %894 }
 0x134   : > { %v340_v60 = vmul.f32 0.6931472, %v895_v59  ;;  %v897_v62 = vpop.eup %896 }
 0x135   : > { %325 = vadd.xlane.f32.xlu0 %v324_v58  ;;  %v352_v5 = vadd.f32 1.0, %v897_v62 }
 0x136   : > { %v346_v3 = vsel %vm345_vm5, %v343_v61, %v340_v60 }
 0x137   : > { %v347_v4 = vadd.f32 %v346_v3, %v331_v63  ;;  %898 = vrcp.f32 %v352_v5 }
 0x139   : > { %v348_v6 = vsel %vm332_vm6, %v1348_v29, %v347_v4 }
 0x13a   : > { %465 = vperm.xlu1 %890, %v348_v6  }
 0x141   : > { %v1359_v7 = vpop.eup %898 }
 0x142   : > { %v490_v8 = vsub.f32 1.0, %v1359_v7 }
 0x14b   : > { %493 = vperm.xlu0 %891, %v490_v8  }
 0x195   : > { %v417_v10 = vpop.permute.xlu0 %416 }
 0x196   : > { %v425_v12 = vmul.f32 %v417_v10, %v1331_v1 }
 0x199   : > { %v412_v9 = vpop.permute.xlu1 %411 }
 0x19a   : > { %v424_v11 = vmul.f32 %v412_v9, %v1329_v0 }
 0x19c   : > { %v427_v15 = vadd.f32 %v425_v12, %v424_v11 }
 0x19d   : > { %v422_v13 = vpop.permute.xlu1 %421 }
 0x19e   : > { %v426_v14 = vmul.f32 %v422_v13, %v1333_v2 }
 0x1a0   : > { %v429_v16 = vsel %vm428_vm7, %v426_v14, 0.0 }
 0x1a1   : > { %v430_v17 = vadd.f32 %v429_v16, %v427_v15 }
 0x1a3   : > { %v431_v18 = vrot.slane %v430_v17, 4 }
 0x1a5   : > { %v432_v19 = vadd.f32 %v431_v18, %v430_v17 }
 0x1a7   : > { %v433_v23 = vrot.slane %v432_v19, 2 }
 0x1a9   : > { %v434_v25 = vadd.f32 %v433_v23, %v432_v19 }
 0x1ab   : > { %v435_v26 = vrot.slane %v434_v25, 1 }
 0x1ac   : > { %v457_v21 = vpop.permute.xlu1 %456 }
 0x1ad   : > { %v459_v22 = vmul.f32 %v457_v21, %v453_v20  ;;  %v436_v28 = vadd.f32 %v435_v26, %v434_v25  ;;  %v789_v26 = vld [vmem:[#allocation2] ss:$0 sm:$0xff] }
 0x1af   : > { %v460_v24 = vmax.f32 %v459_v22, 1e-16 }
 0x1b1   : > { %900 = vrsqrt.f32 %v460_v24 }
 0x1b9   : > { %v466_v27 = vpop.permute.xlu1 %465 }
 0x1ba   : > { %v467_v31 = vrot.slane %v466_v27, 4 }
 0x1bb   : > { %v901_v30 = vpop.eup %900 }
 0x1bc   : > { %v462_v32 = vmul.f32 %v901_v30, %v436_v28 }
 0x1be   : > { %v469_v33 = vmul.f32 %v467_v31, %v462_v32 }
 0x1c0   : > { %v471_v34 = vsel %vm470_vm8, %v469_v33, -inf }
 0x1c1   : > { %472 = vmax.xlane.f32.xlu1 %v471_v34 }
 0x1c2   : > { %v326_v35 = vpop.xlane.xlu0 %325 }
 0x1c3   : > { %v330_v36 = vadd.f32 %v326_v35, %v302_v53 }
 0x1c5   : > { %v358_v37 = vand.u32 2147483647, %v330_v36  ;;  %v355_v47 = vmax.f32 %v330_v36, 0.0  ;;  %vm356_vm10 = vcmp.ne.f32.partialorder %v330_v36, %v330_v36  ;;  %v377_v53 = vsel %vm376_vm11, %v330_v36, -inf }
 0x1c6   : > { %v378_v55 = vmax.f32 %v375_v54, %v377_v53 }
 0x1c7   : > { %v359_v38 = vsub.f32 0.0, %v358_v37 }
 0x1c8   : > { %v379_v56 = vrot.slane %v378_v55, 4 }
 0x1c9   : > { %v360_v39 = vmul.f32 1.442695, %v359_v38 }
 0x1ca   : > { %v380_v57 = vmax.f32 %v378_v55, %v379_v56  ;;  %v494_v27 = vpop.permute.xlu0 %493 }
 0x1cb   : > { %902 = vpow2.f32 %v360_v39  ;;  %v502_v30 = vmul.f32 %v789_v26, %v494_v27 }
 0x1cc   : > { %v381_v58 = vrot.slane %v380_v57, 2 }
 0x1cd   : > { %v504_v34 = vrot.slane %v502_v30, 5 }
 0x1ce   : > { %v382_v59 = vmax.f32 %v380_v57, %v381_v58 }
 0x1d0   : > { %v383_v60 = vrot.slane %v382_v59, 1 }
 0x1d2   : > { %v384_v61 = vmax.f32 %v382_v59, %v383_v60  ;;  %v808_v59 = vpack.c.bf16 %v1331_v1, %v1329_v0  ;;  %v1120_v60 = vmov 0.0|0.0  }
 0x1d3   : > { %807 = vmatprep.subr.bf16.mxu0 %v1120_v60 }
 0x1d4   : > { %v385_v62 = vsub.f32 %v1348_v29, %v384_v61  ;;  %v386_v63 = vsub.f32 %v330_v36, %v384_v61  ;;  %v1122_v61 = vmov 0.0   ;;  %809 = vmatpush3.bf16.xpose.msra.mxu0 %v808_v59 }
 0x1d5   : > { %v903_v40 = vpop.eup %902  ;;  %804 = vmatprep.mubr.msk.f32.mxu0 %vm1121_vm0, %v1122_v61  ;;  %802 = vmatprep.subr.mxu0 %v1122_v61 }
 0x1d6   : > { %v362_v41 = vadd.f32 1.0, %v903_v40  ;;  %v365_v42 = vmul.f32 -0.5, %v903_v40  ;;  %v368_v44 = vand.u32 2147483647, %v903_v40  ;;  %v387_v3 = vmul.f32 1.442695, %v385_v62 }
 0x1d7   : > { %v389_v4 = vmul.f32 1.442695, %v386_v63 }
 0x1d8   : > { %904 = vlog2.f32 %v362_v41  ;;  %v366_v43 = vadd.f32 1.0, %v365_v42  ;;  %vm369_vm9 = vcmp.lt.f32.partialorder %v368_v44, 0.0004427343 }
 0x1d9   : > { %906 = vpow2.f32 %v387_v3 }
 0x1da   : > { %v367_v45 = vmul.f32 %v903_v40, %v366_v43  ;;  %908 = vpow2.f32 %v389_v4 }
 0x1dc   : > { %803 = vmatpush3.xpose.msra.mxu0 %v1333_v2 }
 0x1e2   : > { %v905_v46 = vpop.eup %904 }
 0x1e3   : > { %v364_v48 = vmul.f32 0.6931472, %v905_v46  ;;  %v907_v5 = vpop.eup %906 }
 0x1e4   : > { %v909_v6 = vpop.eup %908  ;;  %v394_v8 = vrot.slane %v907_v5, 6 }
 0x1e5   : > { %v370_v49 = vsel %vm369_vm9, %v367_v45, %v364_v48  ;;  %v395_v9 = vrot.slane %v909_v6, 6 }
 0x1e6   : > { %v371_v50 = vadd.f32 %v370_v49, %v355_v47 }
 0x1e7   : > { %v396_v10 = vsel %vm393_vm13, %v394_v8, %v395_v9 }
 0x1e8   : > { %v372_v51 = vsel %vm356_vm10, %v330_v36, %v371_v50  ;;  %v399_v11 = vsel %vm398_vm14, %v396_v10, 0.0 }
 0x1e9   : > { %v373_v52 = vadd.f32 1.0, %v372_v51  ;;  %v400_v12 = vrot.slane %v399_v11, 4 }
 0x1eb   : > { %543 = vperm.xlu0 %891, %v373_v52   ;;  %v401_v16 = vadd.f32 %v400_v12, %v399_v11 }
 0x1ed   : > { %v402_v29 = vrot.slane %v401_v16, 2 }
 0x1ef   : > { %v403_v17 = vadd.f32 %v402_v29, %v401_v16 }
 0x1f1   : > { %v404_v19 = vrot.slane %v403_v17, 1 }
 0x1f3   : > { %v405_v21 = vadd.f32 %v404_v19, %v403_v17 }
 0x24e   : > { %v473_v13 = vpop.xlane.xlu1 %472 }
 0x24f   : > { %v474_v14 = vsub.f32 %v469_v33, %v473_v13 }
 0x251   : > { %v475_v15 = vmul.f32 1.442695, %v474_v14 }
 0x253   : > { %910 = vpow2.f32 %v475_v15 }
 0x254   : > { %912 = vrcp.f32 %v405_v21 }
 0x25d   : > { %v911_v18 = vpop.eup %910 }
 0x25e   : > { %v477_v20 = vsel %vm470_vm8, %v911_v18, 0.0  ;;  %v913_v22 = vpop.eup %912 }
 0x25f   : > { %478 = vadd.xlane.f32.xlu1 %v477_v20  ;;  %v407_v23 = vmul.f32 %v913_v22, %v907_v5  ;;  %v408_v24 = vmul.f32 %v913_v22, %v909_v6 }
 0x26a   : > { %v544_v53 = vpop.permute.xlu0 %543 }
 0x270   : > { %485 = vperm.xlu1 %890, %v1359_v7  }
 0x274   : > { %513 = vperm.xlu1 %890, %v407_v23  }
 0x278   : > { %530 = vperm.xlu1 %890, %v408_v24  }
 0x2ec   : > { %v479_v25 = vpop.xlane.xlu1 %478 }
 0x2ed   : > { %914 = vrcp.f32 %v479_v25 }
 0x2f0   : > { %v486_v28 = vpop.permute.xlu1 %485 }
 0x2f1   : > { %v487_v33 = vrot.slane %v486_v28, 5 }
 0x2f4   : > { %v514_v7 = vpop.permute.xlu1 %513 }
 0x2f7   : > { %v915_v31 = vpop.eup %914 }
 0x2f8   : > { %v481_v32 = vmul.f32 %v915_v31, %v911_v18  ;;  %v531_v37 = vpop.permute.xlu1 %530 }
 0x2fa   : > { %v489_v35 = vmul.f32 %v487_v33, %v481_v32 }
 0x2fc   : > { %v506_v36 = vadd.f32 %v504_v34, %v489_v35 }
 0x2fe   : > { %507 = vrot.lane.b32.xlu1 %v506_v36, %s1118_s10  ;;  %v521_v38 = vrot.slane %v506_v36, 1 }
 0x300   : > { %v523_v40 = vmul.f32 %v521_v38, %v514_v7 }
 0x302   : > { %509 = vrot.lane.b32.xlu1 %v506_v36, %s1119_s11  ;;  %v525_v44 = vrot.slane %v523_v40, 1 }
 0x370   : > { %v508_v39 = vpop.permute.xlu1 %507 }
 0x371   : > { %v517_v41 = vrot.slane %v508_v39, 2 }
 0x373   : > { %v519_v42 = vmul.f32 %v517_v41, %v514_v7 }
 0x374   : > { %v510_v43 = vpop.permute.xlu1 %509 }
 0x375   : > { %v533_v45 = vmul.f32 %v531_v37, %v510_v43  ;;  %v527_v46 = vadd.f32 %v525_v44, %v519_v42 }
 0x377   : > { %v535_v47 = vrot.slane %v533_v45, 2 }
 0x379   : > { %v537_v48 = vadd.f32 %v535_v47, %v527_v46 }
 0x37b   : > { %v538_v49 = vmax.f32 %v537_v48, 1e-30 }
 0x37d   : > { %916 = vlog2.f32 %v538_v49 }
 0x387   : > { %v917_v50 = vpop.eup %916 }
 0x388   : > { %v540_v51 = vmul.f32 0.6931472, %v917_v50 }
 0x38a   : > { %v547_v52 = vrot.slane %v540_v51, 5 }
 0x38c   : > { %v549_v54 = vmul.f32 %v547_v52, %v544_v53 }
 0x38e   : > { %v550_v55 = vmul.f32 1.442695, %v549_v54 }
 0x390   : > { %918 = vpow2.f32 %v550_v55 }
 0x39a   : > { %v919_v56 = vpop.eup %918 }
 0x39b   : > { %v552_v57 = vand.u32 2147483647, %v919_v56 }
 0x39d   : > { %v554_v58 = vsel %vm553_vm15, %v552_v57, 0.0 }
 0x39e   : > { %555 = vadd.xlane.f32.xlu1 %v554_v58 }
 0x42b   : > { %v556_v62 = vpop.xlane.xlu1 %555 }
 0x42c   : > { %v557_v63 = vmax.f32 %v556_v62, 1e-12 }
 0x42e   : > { %920 = vrcp.f32 %v557_v63 }
 0x438   : > { %v921_v3 = vpop.eup %920 }
 0x439   : > { %v559_v0 = vmul.f32 %v921_v3, %v919_v56 }
 0x43b   : > { %560 = vst [vmem:[#allocation2 - $0x1] sm:$0x2] %v559_v0  ;;  %v563_v1 = vrot.slane %v559_v0, 1  ;;  %561 = vst [vmem:[%s274_s15 - $0x1] sm:$0x2] %v559_v0 }
 0x43d   : > { %805 = vmatmul.mubr.f32.vlgmr.msra.gmra.mrb[0].mxu0 %v563_v1 }
 0x43e   : > { %1021 = shalt.err (!%p1018_p10)
}
 0x43f   : > { %s1022_s15 = scalar_lea.hbm %s1381_s30, 16  ;;  %s1026_s11 = scalar_lea.hbm %s1460_s5, 128 }
 0x440   : > { %p1023_p13 = scmp.ne.s32.totalorder %s1381_s30, %s1022_s15  ;;  %p1027_p8 = scmp.lt.u32.totalorder %s1381_s30, %s1460_s5 }
 0x441   : > { %p1028_p11 = scmp.lt.u32.totalorder %s1026_s11, %s1022_s15  ;;  %p1030_p2 = scmp.lt.u32.totalorder %s1022_s15, %s1381_s30 }
 0x442   : > { %p1024_p5 = pnand %p1023_p13, %p1268_p4 }
 0x443   : > { %p1029_p1 = por %p1028_p11, %p1027_p8 }
 0x444   : > { %p1025_p0 = pneg %p1024_p5 }
 0x445   : > { %p1031_p6 = por %p1030_p2, %p1029_p1 }
 0x447   : > { %p1032_p9 = pnand %p1031_p6, %p1025_p0 }
 0x449   : > { %1035 = shalt.err (!%p1032_p9)
}
 0x44a   : > { %821 = dma.vmem_to_hbm [thread:$0]  (%p1268_p4), %s668_s6, 16, %s1381_s30, %s642_s16   ;;  %vm635_vm1 = vcmask 155648  }
 0x44b   : > { %s654_s8 = sshll.u32 %s268_s26, 4  ;;  %s1410_s24 = scalar_lea.hbm %s1459_s4, %s790_s29  ;;  %s1412_s8 = int_to_ptr.vmem [resolvable:$true] %s654_s8 }
 0x44c   : > { %s638_s15 = scalar_lea.sflag [#allocation6], %s1317_s28  ;;  %s1036_s30 = scalar_lea.vmem %s1412_s8, 16 }
 0x44d   : > { %p1037_p12 = scmp.ne.s32.totalorder %s1412_s8, %s1036_s30  ;;  %s1124_s22 = smov [#allocation10]  }
 0x44e   : > { %s1040_s6 = sshll.u32 %s1124_s22, 4  ;;  %s1041_s6 = int_to_ptr.vmem [resolvable:$false] %s1040_s6 }
 0x44f   : > { %p1038_p3 = pnand %p1037_p12, %p1268_p4  ;;  %s1042_s29 = scalar_lea.vmem %s1041_s6, 32 }
 0x450   : > { %p1043_p10 = scmp.lt.s32.totalorder %s1412_s8, %s1041_s6  ;;  %p1044_p13 = scmp.lt.s32.totalorder %s1042_s29, %s1036_s30 }
 0x451   : > { %p1039_p7 = pneg %p1038_p3 }
 0x452   : > { %p1045_p5 = por %p1044_p13, %p1043_p10 }
 0x454   : > { %p1046_p0 = pnand %p1045_p5, %p1039_p7 }
 0x510   : > { %v631_v2 = vpop.f32.mrb[0].mxu0 }
 0x511   : > { %636 = vst.msk [vmem:[%s268_s26] sm:$0x1] %vm635_vm1, %v631_v2  ;;  %v806_v4 = vpop.f32.mrb[1].mxu0 }
 0x512   : > { %1049 = shalt.err (!%p1046_p0)
}
 0x513   : > { %s1050_s28 = scalar_lea.hbm %s1410_s24, 16  ;;  %s1054_s9 = scalar_lea.hbm %s1459_s4, 128 }
 0x514   : > { %p1051_p8 = scmp.ne.s32.totalorder %s1410_s24, %s1050_s28  ;;  %p1055_p2 = scmp.lt.u32.totalorder %s1410_s24, %s1459_s4 }
 0x515   : > { %p1056_p6 = scmp.lt.u32.totalorder %s1054_s9, %s1050_s28  ;;  %p1058_p12 = scmp.lt.u32.totalorder %s1050_s28, %s1410_s24 }
 0x516   : > { %p1052_p11 = pnand %p1051_p8, %p1268_p4 }
 0x517   : > { %p1057_p9 = por %p1056_p6, %p1055_p2 }
 0x518   : > { %p1053_p1 = pneg %p1052_p11 }
 0x519   : > { %p1059_p3 = por %p1058_p12, %p1057_p9 }
 0x51b   : > { %p1060_p7 = pnand %p1059_p3, %p1053_p1 }
 0x51d   : > { %1063 = shalt.err (!%p1060_p7)
}
 0x51e   : > { %820 = dma.vmem_to_hbm [thread:$0]  (%p1268_p4), %s1412_s8, 16, %s1410_s24, %s638_s15  }
 0x51f PF: > { %p847_p10 = scmp.ge.s32.totalorder %s1110_s21, 2  ;;  %s679_s17 = sand.u32 1, %s1098_s18  }
 0x520   : > { %p1476_p13 = scmp.ne.s32.totalorder %s1465_s25, 0  ;;  %s680_s7 = scalar_lea.sflag [#allocation6], %s679_s17 }
 0x522   : > { %p836_p5 = pnand %p847_p10, %p1476_p13 }
 0x524   : > { %1089 = dma.done.wait (!%p836_p5), %s680_s7, 16  }
 0x525   : > { %1091 = vsyncadd (!%p836_p5), %s680_s7, 4294967280  ;;  %s688_s12 = scalar_lea.sflag [#allocation12], %s679_s17 }
 0x526   : > { %1093 = dma.done.wait (!%p836_p5), %s688_s12, 16  }
 0x527   : > { %1095 = vsyncadd (!%p836_p5), %s688_s12, 4294967280  ;;  %p23_p4 = scmp.ge.s32.totalorder %s1258_s14, 10   ;;  %s1477_s18 = smov %s1102_s19 }
 0x528   : > { %s1478_s19 = smov %s1106_s20  ;;  %s1479_s20 = smov %s1274_s27 }
 0x529   : > { %s1480_s21 = smov %s1258_s14  ;;  %25 = sbr.rel (!%p23_p4) target bundleno = 8 (0x8), region = 110 }
 0x530   :  { %692 = vsyncpa [#allocation5], 1 }
 0x531   :  { %694 = vsyncpa [#allocation5 + $0x1], 1 }
 0x532   :  { %695 = vsyncpa [#allocation8], 1 }
 0x533   :  { %696 = vsyncpa [#allocation6], 1 }
 0x534   :  { %698 = vsyncpa [#allocation6 + $0x1], 1 }
 0x535   :  { %699 = vsyncpa [#allocation12], 1 }
 0x536   :  { %701 = vsyncpa [#allocation12 + $0x1], 1 }

</bundles_post_ra>
